<compile_context>
chip_gen: v7x
topology: tpu7x:2x2x1
jax: 0.10.0
libtpu: 0.0.40
codegen_flags: <defaults>
</compile_context>

<pallas_src>
import functools
import math

import jax
import jax.numpy as jnp
from jax.experimental import pallas as pl
from jax.experimental.pallas import tpu as pltpu


# --------------------------------------------------------------------------- #
# Kernel bodies
# --------------------------------------------------------------------------- #
def _cell_update(i_g, f_g, g_g, o_g, c_prev_f32):
    """LSTM gate nonlinearity + cell/hidden update, all in f32."""
    c_new = jax.nn.sigmoid(f_g) * c_prev_f32 + jax.nn.sigmoid(i_g) * jnp.tanh(g_g)
    h_new = jax.nn.sigmoid(o_g) * jnp.tanh(c_new)
    return h_new, c_new


def _lstm_fused_kernel(xh_ref, w_ref, b_ref, c_ref, h_out_ref, c_out_ref,
                       *acc_refs, hidden, n_k):
    """Fused wide-N path (hidden % 128 == 0).

    xh_ref: (tm, tk)     fused [x, h] activation tile (bf16 or f32)
    w_ref:  (tk, 4H)     native-layout stacked weights [W_ih; W_hh]
    b_ref:  (1, 4H)      pre-summed bias (f32)
    c_ref:  (tm, H)      previous cell state tile
    acc_refs: ((tm,4H) f32 scratch,) only when n_k > 1
    """
    part = jnp.dot(xh_ref[...], w_ref[...], preferred_element_type=jnp.float32)

    def finalize(gate_mat):
        gates = gate_mat + b_ref[...].astype(jnp.float32)            # (tm, 4H)
        H = hidden
        h_new, c_new = _cell_update(
            gates[:, 0 * H:1 * H], gates[:, 1 * H:2 * H],
            gates[:, 2 * H:3 * H], gates[:, 3 * H:4 * H],
            c_ref[...].astype(jnp.float32))
        c_out_ref[...] = c_new.astype(c_out_ref.dtype)
        h_out_ref[...] = h_new.astype(h_out_ref.dtype)

    if n_k == 1:
        # No-reduction fast path: no scratch accumulator at all.
        finalize(part)
    else:
        acc_ref, = acc_refs
        k = pl.program_id(1)

        @pl.when(k == 0)
        def _():
            acc_ref[...] = part                                      # plain store

        @pl.when(k > 0)
        def _():
            acc_ref[...] += part

        @pl.when(k == n_k - 1)
        def _():
            finalize(acc_ref[...])


def _lstm_gate_major_kernel(xh_ref, w_ref, b_ref, c_ref, h_out_ref, c_out_ref,
                            *acc_refs, n_k):
    """Fallback path (hidden not 128-aligned): gate-major (4, K, H) weights.

    xh_ref: (tm, tk); w_ref: (4, tk, H); b_ref: (4, H); c_ref: (tm, H)
    acc_refs: 4x (tm, H) f32 scratch, only when n_k > 1
    """
    xh = xh_ref[...]
    parts = [jnp.dot(xh, w_ref[g], preferred_element_type=jnp.float32)
             for g in range(4)]

    def finalize(gate_vals):
        b = b_ref[...].astype(jnp.float32)                           # (4, H)
        i_g, f_g, g_g, o_g = (gate_vals[g] + b[g:g + 1, :] for g in range(4))
        h_new, c_new = _cell_update(i_g, f_g, g_g, o_g,
                                    c_ref[...].astype(jnp.float32))
        c_out_ref[...] = c_new.astype(c_out_ref.dtype)
        h_out_ref[...] = h_new.astype(h_out_ref.dtype)

    if n_k == 1:
        finalize(parts)
    else:
        k = pl.program_id(1)

        @pl.when(k == 0)
        def _():
            for g in range(4):
                acc_refs[g][...] = parts[g]

        @pl.when(k > 0)
        def _():
            for g in range(4):
                acc_refs[g][...] += parts[g]

        @pl.when(k == n_k - 1)
        def _():
            finalize([acc_refs[g][...] for g in range(4)])


# --------------------------------------------------------------------------- #
# Wrapper
# --------------------------------------------------------------------------- #
def _pick_tile(dim, preferred):
    for t in preferred:
        if dim % t == 0:
            return t
    return dim  # small / non-aligned dim: use the full extent (single block)


def _pick_m_tile(batch):
    # Prefer full-MXU-height tiles, but leave >=2 M-blocks when the batch
    # allows so both v7x TensorCores get work (the fused path has no other
    # "parallel" grid axis).
    for t in (256, 128):
        if batch % t == 0 and batch // t >= 2:
            return t
    for t in (512, 256, 128, 64, 32, 16, 8):
        if batch % t == 0:
            return t
    return batch


def prepare_lstm_params(w_ih, w_hh, b_ih, b_hh, *, compute_dtype=jnp.bfloat16):
    """One-time parameter re-layout. Call at parameter init, NOT per step.

    Weight convention matches the reference module: w_ih is (input, 4H),
    w_hh is (H, 4H), gate column order [i, f, g, o] (torch.mm(x, W)).
    """
    input_size, four_h = w_ih.shape
    hidden = four_h // 4
    K = input_size + hidden
    w = jnp.concatenate([w_ih, w_hh], axis=0).astype(compute_dtype)   # (K, 4H)
    b = b_ih.astype(jnp.float32) + b_hh.astype(jnp.float32)           # (4H,)
    if hidden % 128 == 0:
        # Fused wide-N path: keep the native layout (no transpose at all),
        # gate slices at finalize are 128-lane aligned.
        return {"mode": "fused", "w": w, "b": b.reshape(1, four_h),
                "hidden": hidden, "input_size": input_size}
    # H not lane-aligned: gate-major layout so each gate slab is lane-dense.
    w4 = w.reshape(K, 4, hidden).transpose(1, 0, 2)                   # (4, K, H)
    return {"mode": "gate_major", "w": w4, "b": b.reshape(4, hidden),
            "hidden": hidden, "input_size": input_size}


def lstm_cell(x, h_prev, c_prev, params):
    """One LSTMCell step: returns (h_new, c_new)."""
    B, _ = x.shape
    H = params["hidden"]
    K = params["input_size"] + H
    w = params["w"]
    b = params["b"]
    compute_dtype = w.dtype

    # Per-step fused activation, cast to the MXU operand dtype (bf16 default).
    xh = jnp.concatenate([x, h_prev], axis=1).astype(compute_dtype)   # (B, K)

    tm = _pick_m_tile(B)
    tk = _pick_tile(K, (1024, 512, 256, 128))
    n_k = K // tk
    grid = (B // tm, n_k)

    def _w_spec(block_shape, index_map):
        if n_k >= 3:
            # Deeper buffering keeps the HBM weight stream ahead of the MXU.
            return pl.BlockSpec(block_shape, index_map,
                                pipeline_mode=pl.Buffered(3))
        return pl.BlockSpec(block_shape, index_map)

    if params["mode"] == "fused":
        kernel = functools.partial(_lstm_fused_kernel, hidden=H, n_k=n_k)
        in_specs = [
            pl.BlockSpec((tm, tk), lambda i, k: (i, k)),              # xh
            _w_spec((tk, 4 * H), lambda i, k: (k, 0)),                # W (K, 4H)
            pl.BlockSpec((1, 4 * H), lambda i, k: (0, 0)),            # bias
            pl.BlockSpec((tm, H), lambda i, k: (i, 0)),               # c_prev
        ]
        scratch = [pltpu.VMEM((tm, 4 * H), jnp.float32)] if n_k > 1 else []
    else:
        kernel = functools.partial(_lstm_gate_major_kernel, n_k=n_k)
        in_specs = [
            pl.BlockSpec((tm, tk), lambda i, k: (i, k)),              # xh
            _w_spec((4, tk, H), lambda i, k: (0, k, 0)),              # W (4, K, H)
            pl.BlockSpec((4, H), lambda i, k: (0, 0)),                # bias
            pl.BlockSpec((tm, H), lambda i, k: (i, 0)),               # c_prev
        ]
        scratch = ([pltpu.VMEM((tm, H), jnp.float32)] * 4) if n_k > 1 else []

    out_specs = [
        pl.BlockSpec((tm, H), lambda i, k: (i, 0)),                   # h_new
        pl.BlockSpec((tm, H), lambda i, k: (i, 0)),                   # c_new
    ]
    out_shape = (
        jax.ShapeDtypeStruct((B, H), h_prev.dtype),
        jax.ShapeDtypeStruct((B, H), c_prev.dtype),
    )

    grid_spec = pltpu.PrefetchScalarGridSpec(
        num_scalar_prefetch=0,
        grid=grid,
        in_specs=in_specs,
        out_specs=out_specs,
        scratch_shapes=scratch,
    )

    h_new, c_new = pl.pallas_call(
        kernel,
        out_shape=out_shape,
        grid_spec=grid_spec,
        compiler_params=pltpu.CompilerParams(
            dimension_semantics=("parallel", "arbitrary"),
            # Above the 16/32 MiB scoped defaults, safely below v7x's 64 MiB
            # physical VMEM, and roomy enough for tk=1024 bf16 weight tiles at
            # 3-deep buffering on v5e/v6e.
            vmem_limit_bytes=48 * 1024 * 1024,
        ),
    )(xh, w, b, c_prev)
    return h_new, c_new


# --------------------------------------------------------------------------- #
# Reference + test harness
# --------------------------------------------------------------------------- #
def reference_lstm_cell(x, h_prev, c_prev, w_ih, w_hh, b_ih, b_hh):
    gates = x @ w_ih + b_ih + h_prev @ w_hh + b_hh
    H = h_prev.shape[1]
    i_g, f_g, g_g, o_g = (gates[:, g * H:(g + 1) * H] for g in range(4))
    c = jax.nn.sigmoid(f_g) * c_prev + jax.nn.sigmoid(i_g) * jnp.tanh(g_g)
    h = jax.nn.sigmoid(o_g) * jnp.tanh(c)
    return h, c


def _run_case(seed, batch, input_size, hidden, compute_dtype, atol, rtol):
    key = jax.random.PRNGKey(seed)
    k_x, k_h, k_c, k_wih, k_whh, k_bih, k_bhh = jax.random.split(key, 7)

    # Deterministic parameter init mirroring nn.init.uniform_(-stdv, stdv).
    stdv = 1.0 / math.sqrt(hidden)
    w_ih = jax.random.uniform(k_wih, (input_size, 4 * hidden),
                              minval=-stdv, maxval=stdv, dtype=jnp.float32)
    w_hh = jax.random.uniform(k_whh, (hidden, 4 * hidden),
                              minval=-stdv, maxval=stdv, dtype=jnp.float32)
    b_ih = jax.random.uniform(k_bih, (4 * hidden,),
                              minval=-stdv, maxval=stdv, dtype=jnp.float32)
    b_hh = jax.random.uniform(k_bhh, (4 * hidden,),
                              minval=-stdv, maxval=stdv, dtype=jnp.float32)

    x = jax.random.normal(k_x, (batch, input_size), dtype=jnp.float32)
    h0 = jax.random.normal(k_h, (batch, hidden), dtype=jnp.float32)
    c0 = jax.random.normal(k_c, (batch, hidden), dtype=jnp.float32)

    # One-time prep (would live at module init in a real model).
    params = prepare_lstm_params(w_ih, w_hh, b_ih, b_hh,
                                 compute_dtype=compute_dtype)

    h_new, c_new = lstm_cell(x, h0, c0, params)
    jax.block_until_ready((h_new, c_new))

    h_ref, c_ref = reference_lstm_cell(x, h0, c0, w_ih, w_hh, b_ih, b_hh)
    tag = (f"B={batch} in={input_size} H={hidden} "
           f"{params['mode']} {jnp.dtype(compute_dtype).name}")
    assert jnp.allclose(h_new, h_ref, atol=atol, rtol=rtol), f"h mismatch [{tag}]"
    assert jnp.allclose(c_new, c_ref, atol=atol, rtol=rtol), f"c mismatch [{tag}]"


if __name__ == "__main__":
    # Gate-major fallback path (H < 128): exact f32 check + bf16-operand check.
    _run_case(0, batch=8, input_size=16, hidden=32,
              compute_dtype=jnp.float32, atol=1e-5, rtol=1e-5)
    _run_case(0, batch=8, input_size=16, hidden=32,
              compute_dtype=jnp.bfloat16, atol=2e-2, rtol=2e-2)
    # Fused wide-N path (H % 128 == 0): native (K, 4H) weights, one dot.
    _run_case(0, batch=8, input_size=128, hidden=128,
              compute_dtype=jnp.float32, atol=1e-5, rtol=1e-5)
    _run_case(0, batch=8, input_size=128, hidden=128,
              compute_dtype=jnp.bfloat16, atol=2e-2, rtol=2e-2)

    print("KERNEL_OK")
</pallas_src>

<mosaic_0001>
module attributes {stable_mosaic.version = 11 : i64} {
  func.func @_lstm_gate_major_kernel(%arg0: i32, %arg1: i32, %arg2: memref<8x48xf32, #tpu.memory_space<vmem>>, %arg3: memref<4x48x32xf32, #tpu.memory_space<vmem>>, %arg4: memref<4x32xf32, #tpu.memory_space<vmem>>, %arg5: memref<8x32xf32, #tpu.memory_space<vmem>>, %arg6: memref<8x32xf32, #tpu.memory_space<vmem>>, %arg7: memref<8x32xf32, #tpu.memory_space<vmem>>) attributes {dimension_semantics = [#tpu.dimension_semantics<parallel>, #tpu.dimension_semantics<arbitrary>], iteration_bounds = array<i64: 1, 1>, scalar_prefetch = 0 : i64, scratch_operands = 0 : i64, tpu.core_type = #tpu.core_type<tc>, window_params = [{transform_indices = @transform_0, window_bounds = array<i64: 8, 48>}, {transform_indices = @transform_1, window_bounds = array<i64: 4, 48, 32>}, {pipeline_mode = #tpu.pipeline_mode<synchronous>, transform_indices = @transform_2, window_bounds = array<i64: 4, 32>}, {transform_indices = @transform_3, window_bounds = array<i64: 8, 32>}, {transform_indices = @transform_4, window_bounds = array<i64: 8, 32>}, {transform_indices = @transform_5, window_bounds = array<i64: 8, 32>}]} {
    %c0 = arith.constant 0 : index
    %c0_0 = arith.constant 0 : index
    %0 = vector.load %arg2[%c0, %c0_0] : memref<8x48xf32, #tpu.memory_space<vmem>>, vector<8x48xf32>
    %c0_1 = arith.constant 0 : index
    %c0_2 = arith.constant 0 : index
    %c0_3 = arith.constant 0 : index
    %1 = vector.load %arg3[%c0_1, %c0_2, %c0_3] : memref<4x48x32xf32, #tpu.memory_space<vmem>>, vector<1x48x32xf32>
    %2 = vector.shape_cast %1 : vector<1x48x32xf32> to vector<48x32xf32>
    %cst = arith.constant dense<0.000000e+00> : vector<8x32xf32>
    %3 = tpu.matmul %0, %2, %cst {dimension_numbers = #tpu.dot_dimension_numbers<[1], [0], [0], [1], [0, 0, 1, 1], [], []>} : vector<8x48xf32>, vector<48x32xf32>, vector<8x32xf32> -> vector<8x32xf32>
    %c1 = arith.constant 1 : index
    %c0_4 = arith.constant 0 : index
    %c0_5 = arith.constant 0 : index
    %4 = vector.load %arg3[%c1, %c0_4, %c0_5] : memref<4x48x32xf32, #tpu.memory_space<vmem>>, vector<1x48x32xf32>
    %5 = vector.shape_cast %4 : vector<1x48x32xf32> to vector<48x32xf32>
    %cst_6 = arith.constant dense<0.000000e+00> : vector<8x32xf32>
    %6 = tpu.matmul %0, %5, %cst_6 {dimension_numbers = #tpu.dot_dimension_numbers<[1], [0], [0], [1], [0, 0, 1, 1], [], []>} : vector<8x48xf32>, vector<48x32xf32>, vector<8x32xf32> -> vector<8x32xf32>
    %c2 = arith.constant 2 : index
    %c0_7 = arith.constant 0 : index
    %c0_8 = arith.constant 0 : index
    %7 = vector.load %arg3[%c2, %c0_7, %c0_8] : memref<4x48x32xf32, #tpu.memory_space<vmem>>, vector<1x48x32xf32>
    %8 = vector.shape_cast %7 : vector<1x48x32xf32> to vector<48x32xf32>
    %cst_9 = arith.constant dense<0.000000e+00> : vector<8x32xf32>
    %9 = tpu.matmul %0, %8, %cst_9 {dimension_numbers = #tpu.dot_dimension_numbers<[1], [0], [0], [1], [0, 0, 1, 1], [], []>} : vector<8x48xf32>, vector<48x32xf32>, vector<8x32xf32> -> vector<8x32xf32>
    %c3 = arith.constant 3 : index
    %c0_10 = arith.constant 0 : index
    %c0_11 = arith.constant 0 : index
    %10 = vector.load %arg3[%c3, %c0_10, %c0_11] : memref<4x48x32xf32, #tpu.memory_space<vmem>>, vector<1x48x32xf32>
    %11 = vector.shape_cast %10 : vector<1x48x32xf32> to vector<48x32xf32>
    %cst_12 = arith.constant dense<0.000000e+00> : vector<8x32xf32>
    %12 = tpu.matmul %0, %11, %cst_12 {dimension_numbers = #tpu.dot_dimension_numbers<[1], [0], [0], [1], [0, 0, 1, 1], [], []>} : vector<8x48xf32>, vector<48x32xf32>, vector<8x32xf32> -> vector<8x32xf32>
    %c0_13 = arith.constant 0 : index
    %c0_14 = arith.constant 0 : index
    %13 = vector.load %arg4[%c0_13, %c0_14] : memref<4x32xf32, #tpu.memory_space<vmem>>, vector<4x32xf32>
    %14 = vector.extract_strided_slice %13 {offsets = [0, 0], sizes = [1, 32], strides = [1, 1]} : vector<4x32xf32> to vector<1x32xf32>
    %15 = vector.broadcast %14 : vector<1x32xf32> to vector<8x32xf32>
    %16 = arith.addf %3, %15 : vector<8x32xf32>
    %17 = vector.extract_strided_slice %13 {offsets = [1, 0], sizes = [1, 32], strides = [1, 1]} : vector<4x32xf32> to vector<1x32xf32>
    %18 = vector.broadcast %17 : vector<1x32xf32> to vector<8x32xf32>
    %19 = arith.addf %6, %18 : vector<8x32xf32>
    %20 = vector.extract_strided_slice %13 {offsets = [2, 0], sizes = [1, 32], strides = [1, 1]} : vector<4x32xf32> to vector<1x32xf32>
    %21 = vector.broadcast %20 : vector<1x32xf32> to vector<8x32xf32>
    %22 = arith.addf %9, %21 : vector<8x32xf32>
    %23 = vector.extract_strided_slice %13 {offsets = [3, 0], sizes = [1, 32], strides = [1, 1]} : vector<4x32xf32> to vector<1x32xf32>
    %24 = vector.broadcast %23 : vector<1x32xf32> to vector<8x32xf32>
    %25 = arith.addf %12, %24 : vector<8x32xf32>
    %c0_15 = arith.constant 0 : index
    %c0_16 = arith.constant 0 : index
    %26 = vector.load %arg5[%c0_15, %c0_16] : memref<8x32xf32, #tpu.memory_space<vmem>>, vector<8x32xf32>
    %27 = arith.negf %19 : vector<8x32xf32>
    %28 = math.exp %27 : vector<8x32xf32>
    %cst_17 = arith.constant 1.000000e+00 : f32
    %29 = vector.broadcast %cst_17 : f32 to vector<8x32xf32>
    %30 = arith.addf %29, %28 : vector<8x32xf32>
    %31 = arith.divf %29, %30 : vector<8x32xf32>
    %32 = arith.mulf %31, %26 : vector<8x32xf32>
    %33 = arith.negf %16 : vector<8x32xf32>
    %34 = math.exp %33 : vector<8x32xf32>
    %cst_18 = arith.constant 1.000000e+00 : f32
    %35 = vector.broadcast %cst_18 : f32 to vector<8x32xf32>
    %36 = arith.addf %35, %34 : vector<8x32xf32>
    %37 = arith.divf %35, %36 : vector<8x32xf32>
    %38 = math.tanh %22 : vector<8x32xf32>
    %39 = arith.mulf %37, %38 : vector<8x32xf32>
    %40 = arith.addf %32, %39 : vector<8x32xf32>
    %41 = arith.negf %25 : vector<8x32xf32>
    %42 = math.exp %41 : vector<8x32xf32>
    %cst_19 = arith.constant 1.000000e+00 : f32
    %43 = vector.broadcast %cst_19 : f32 to vector<8x32xf32>
    %44 = arith.addf %43, %42 : vector<8x32xf32>
    %45 = arith.divf %43, %44 : vector<8x32xf32>
    %46 = math.tanh %40 : vector<8x32xf32>
    %47 = arith.mulf %45, %46 : vector<8x32xf32>
    %c0_20 = arith.constant 0 : index
    %c0_21 = arith.constant 0 : index
    %48 = vector.load %arg7[%c0_20, %c0_21] : memref<8x32xf32, #tpu.memory_space<vmem>>, vector<8x32xf32>
    tpu.vector_store %arg7[%c0_20, %c0_21], %40 {strides = array<i32>} : memref<8x32xf32, #tpu.memory_space<vmem>>, vector<8x32xf32>,
    %c0_22 = arith.constant 0 : index
    %c0_23 = arith.constant 0 : index
    %49 = vector.load %arg6[%c0_22, %c0_23] : memref<8x32xf32, #tpu.memory_space<vmem>>, vector<8x32xf32>
    tpu.vector_store %arg6[%c0_22, %c0_23], %47 {strides = array<i32>} : memref<8x32xf32, #tpu.memory_space<vmem>>, vector<8x32xf32>,
    return
  }
  func.func @transform_0(%arg0: i32, %arg1: i32) -> (i32, i32) {
    %c0_i32 = arith.constant 0 : i32
    return %arg0, %arg1 : i32, i32
  }
  func.func @transform_1(%arg0: i32, %arg1: i32) -> (i32, i32, i32) {
    %c0_i32 = arith.constant 0 : i32
    %c0_i32_0 = arith.constant 0 : i32
    %c0_i32_1 = arith.constant 0 : i32
    return %c0_i32, %arg1, %c0_i32_0 : i32, i32, i32
  }
  func.func @transform_2(%arg0: i32, %arg1: i32) -> (i32, i32) {
    %c0_i32 = arith.constant 0 : i32
    %c0_i32_0 = arith.constant 0 : i32
    %c0_i32_1 = arith.constant 0 : i32
    return %c0_i32, %c0_i32_0 : i32, i32
  }
  func.func @transform_3(%arg0: i32, %arg1: i32) -> (i32, i32) {
    %c0_i32 = arith.constant 0 : i32
    %c0_i32_0 = arith.constant 0 : i32
    return %arg0, %c0_i32 : i32, i32
  }
  func.func @transform_4(%arg0: i32, %arg1: i32) -> (i32, i32) {
    %c0_i32 = arith.constant 0 : i32
    %c0_i32_0 = arith.constant 0 : i32
    return %arg0, %c0_i32 : i32, i32
  }
  func.func @transform_5(%arg0: i32, %arg1: i32) -> (i32, i32) {
    %c0_i32 = arith.constant 0 : i32
    %c0_i32_0 = arith.constant 0 : i32
    return %arg0, %c0_i32 : i32, i32
  }
}

</mosaic_0001>

<bundles_post_ra>
// kernel: tpu_custom_call.1
= control target key start
LH: loop header
LB: loop body
LE: loop exit
PB: predicated region body
PF: predicated region fallthrough
CT: control target
= control target key end

     0   :  { %11 = vsyncpa [#allocation3], 0  ;;  %v624_v3 = vmov 0.0|0.0   ;;  %vm625_vm0 = vmmov 0   ;;  %v626_v11 = vmov 0.0   ;;  %s786_s0 = inlined_call_operand.vmem [shape: f32[8,48], index: 0, kind: input, shape index: {}]   ;;  %s787_s1 = inlined_call_operand.vmem [shape: f32[4,48,32], index: 1, kind: input, shape index: {}]   ;;  %s788_s2 = inlined_call_operand.vmem [shape: f32[4,32], index: 2, kind: input, shape index: {}]   ;;  %s789_s3 = inlined_call_operand.vmem [shape: f32[8,32], index: 3, kind: input, shape index: {}]   ;;  %s790_s4 = inlined_call_operand.hbm [shape: f32[8,32], index: 4, kind: output, shape index: {0}]   ;;  %s791_s5 = inlined_call_operand.hbm [shape: f32[8,32], index: 5, kind: output, shape index: {1}]  }
   0x1   :  { %v22_v0 = vld [vmem:[%s787_s1] sm:$0xff]  ;;  %v23_v1 = vld [vmem:[%s787_s1 + $0x8] sm:$0xff]  ;;  %v406_v2 = vld [vmem:[%s787_s1 + $0x30] sm:$0xff]  ;;  %519 = vmatprep.subr.bf16.mxu0 %v624_v3  ;;  %528 = vmatprep.subr.bf16.mxu1 %v624_v3 }
   0x2   :  { %v520_v4 = vpack.c.bf16 %v23_v1, %v22_v0  ;;  %v407_v5 = vld [vmem:[%s787_s1 + $0x38] sm:$0xff]  ;;  %v24_v6 = vld [vmem:[%s787_s1 + $0x10] sm:$0xff]  ;;  %v408_v9 = vld [vmem:[%s787_s1 + $0x40] sm:$0xff]  ;;  %471 = vmatprep.mubr.msk.f32.mxu0 %vm625_vm0, %v626_v11  ;;  %486 = vmatprep.mubr.msk.f32.mxu1 %vm625_vm0, %v626_v11 }
   0x3   :  { %v25_v7 = vld [vmem:[%s787_s1 + $0x18] sm:$0xff]  ;;  %v529_v8 = vpack.c.bf16 %v407_v5, %v406_v2  ;;  %v409_v10 = vld [vmem:[%s787_s1 + $0x48] sm:$0xff]  ;;  %v26_v14 = vld [vmem:[%s787_s1 + $0x20] sm:$0xff] }
   0x4   :  { %521 = vmatpush3.bf16.msra.mxu0 %v520_v4  ;;  %v523_v12 = vpack.c.bf16 %v25_v7, %v24_v6  ;;  %v532_v13 = vpack.c.bf16 %v409_v10, %v408_v9  ;;  %v27_v15 = vld [vmem:[%s787_s1 + $0x28] sm:$0xff]  ;;  %v410_v16 = vld [vmem:[%s787_s1 + $0x50] sm:$0xff]  ;;  %v411_v17 = vld [vmem:[%s787_s1 + $0x58] sm:$0xff] }
   0x5   :  { %530 = vmatpush3.bf16.msra.mxu1 %v529_v8  ;;  %522 = vmatprep.subr.bf16.mxu0 %v624_v3  ;;  %v526_v18 = vpack.c.bf16 %v27_v15, %v26_v14  ;;  %v535_v19 = vpack.c.bf16 %v411_v17, %v410_v16  ;;  %v412_v20 = vld [vmem:[%s787_s1 + $0x60] sm:$0xff]  ;;  %v413_v21 = vld [vmem:[%s787_s1 + $0x68] sm:$0xff] }
   0x6   :  { %531 = vmatprep.subr.bf16.mxu1 %v624_v3 }
   0x8   :  { %524 = vmatpush3.bf16.msra.mxu0 %v523_v12 }
   0x9   :  { %533 = vmatpush3.bf16.msra.mxu1 %v532_v13  ;;  %525 = vmatprep.subr.bf16.mxu0 %v624_v3 }
   0xa   :  { %12 = vsyncpa [#allocation5], 0  ;;  %534 = vmatprep.subr.bf16.mxu1 %v624_v3  ;;  %v418_v22 = vld [vmem:[%s787_s1 + $0x90] sm:$0xff]  ;;  %v419_v23 = vld [vmem:[%s787_s1 + $0x98] sm:$0xff]  ;;  %vm54_vm1 = vcmask 392192   ;;  %v538_v25 = vpack.c.bf16 %v413_v21, %v412_v20  ;;  %v50_v39 = vlaneseq  ;;  %s627_s19 = smov [#allocation4]  }
   0xb   :  { %v21_v24 = vld [vmem:[%s786_s0] sm:$0xff]  ;;  %v547_v26 = vpack.c.bf16 %v419_v23, %v418_v22  ;;  %v414_v27 = vld [vmem:[%s787_s1 + $0x70] sm:$0xff]  ;;  %v415_v28 = vld [vmem:[%s787_s1 + $0x78] sm:$0xff]  ;;  %s394_s20 = sshll.u32 %s627_s19, 4  ;;  %vm375_vm2 = vcmask 261120   ;;  %s395_s20 = int_to_ptr.vmem [resolvable:$true] %s394_s20 }
   0xc   :  { %527 = vmatpush3.bf16.msra.mxu0 %v526_v18  ;;  %v420_v29 = vld [vmem:[%s787_s1 + $0xa0] sm:$0xff]  ;;  %v421_v30 = vld [vmem:[%s787_s1 + $0xa8] sm:$0xff]  ;;  %v541_v31 = vpack.c.bf16 %v415_v28, %v414_v27  ;;  %v422_v35 = vld [vmem:[%s787_s1 + $0xb0] sm:$0xff]  ;;  %v51_v40 = vshrl.u32 %v50_v39, 7  ;;  %s576_s21 = scalar_lea.vmem %s395_s20, 128  ;;  %p581_p1 = scmp.lt.s32.totalorder %s395_s20, %s395_s20 }
   0xd   :  { %536 = vmatpush3.bf16.msra.mxu1 %v535_v19  ;;  %537 = vmatprep.subr.bf16.mxu0 %v624_v3  ;;  %v550_v32 = vpack.c.bf16 %v421_v30, %v420_v29  ;;  %v416_v33 = vld [vmem:[%s787_s1 + $0x80] sm:$0xff]  ;;  %v417_v34 = vld [vmem:[%s787_s1 + $0x88] sm:$0xff]  ;;  %v423_v36 = vld [vmem:[%s787_s1 + $0xb8] sm:$0xff]  ;;  %p577_p0 = scmp.ne.s32.totalorder %s395_s20, %s576_s21  ;;  %p582_p2 = scmp.lt.s32.totalorder %s576_s21, %s576_s21 }
   0xe   :  { %546 = vmatprep.subr.bf16.mxu1 %v624_v3  ;;  %v544_v37 = vpack.c.bf16 %v417_v34, %v416_v33  ;;  %v553_v38 = vpack.c.bf16 %v423_v36, %v422_v35  ;;  %v52_v41 = vsub.s32 0, %v51_v40  ;;  %v49_v42 = vld [vmem:[%s788_s2] sm:$0xf]  ;;  %v130_v43 = vsub.s32 1, %v51_v40 }
   0xf   :  { %472 = vmatmul.mubr.msk.f32.vlgmr.msra.gmra.mrb[0].mxu0 %vm54_vm1, %v21_v24  ;;  %v204_v54 = vsub.s32 2, %v51_v40  ;;  %v278_v55 = vsub.s32 3, %v51_v40  ;;  %v350_v6 = vld [vmem:[%s789_s3] sm:$0xff]  ;;  %p583_p3 = por %p582_p2, %p581_p1 }
  0x10   :  { %487 = vmatmul.mubr.msk.f32.vlgmr.msra.gmra.mrb[0].mxu1 %vm54_vm1, %v21_v24  ;;  %539 = vmatpush3.bf16.msra.mxu0 %v538_v25  ;;  %v53_v44 = vrot.slane %v49_v42, %v52_v41  ;;  %v131_v45 = vrot.slane %v49_v42, %v130_v43 }
  0x11   :  { %548 = vmatpush3.bf16.msra.mxu1 %v547_v26  ;;  %540 = vmatprep.subr.bf16.mxu0 %v624_v3  ;;  %v205_v56 = vrot.slane %v49_v42, %v204_v54  ;;  %v279_v57 = vrot.slane %v49_v42, %v278_v55  ;;  %p584_p4 = pnand %p583_p3, %p577_p0 }
  0x12   :  { %549 = vmatprep.subr.bf16.mxu1 %v624_v3  ;;  %501 = vmatprep.mubr.msk.f32.mxu0 %vm625_vm0, %v626_v11 }
  0x13   :  { %516 = vmatprep.mubr.msk.f32.mxu1 %vm625_vm0, %v626_v11 }
  0x14   :  { %542 = vmatpush3.bf16.msra.mxu0 %v541_v31 }
  0x15   :  { %551 = vmatpush3.bf16.msra.mxu1 %v550_v32  ;;  %543 = vmatprep.subr.bf16.mxu0 %v624_v3 }
  0x16   :  { %552 = vmatprep.subr.bf16.mxu1 %v624_v3 }
  0x18   :  { %545 = vmatpush3.bf16.msra.mxu0 %v544_v37 }
  0x19   :  { %554 = vmatpush3.bf16.msra.mxu1 %v553_v38 }
  0x1b   :  { %502 = vmatmul.mubr.msk.f32.vlgmr.msra.gmra.mrb[2].mxu0 %vm54_vm1, %v21_v24 }
  0x1c   :  { %517 = vmatmul.mubr.msk.f32.vlgmr.msra.gmra.mrb[2].mxu1 %vm54_vm1, %v21_v24 }
  0xe2   :  { %v124_v46 = vpop.f32.mrb[0].mxu0 }
  0xe3   :  { %v125_v47 = vadd.f32 %v124_v46, %v53_v44  ;;  %v198_v48 = vpop.f32.mrb[0].mxu1  ;;  %v473_v49 = vpop.f32.mrb[1].mxu0 }
  0xe4   :  { %v199_v50 = vadd.f32 %v198_v48, %v131_v45  ;;  %v488_v51 = vpop.f32.mrb[1].mxu1 }
  0xe5   :  { %v429_v52 = vmul.f32 -1.442695, %v125_v47 }
  0xe6   :  { %v428_v53 = vmul.f32 -1.442695, %v199_v50 }
  0xe7   :  { %560 = vpow2.f32 %v429_v52 }
  0xe8   :  { %562 = vpow2.f32 %v428_v53 }
  0xee   :  { %v272_v58 = vpop.f32.mrb[2].mxu0 }
  0xef   :  { %v273_v59 = vadd.f32 %v272_v58, %v205_v56  ;;  %v346_v60 = vpop.f32.mrb[2].mxu1  ;;  %v503_v61 = vpop.f32.mrb[3].mxu0 }
  0xf0   :  { %v347_v62 = vadd.f32 %v346_v60, %v279_v57  ;;  %v518_v63 = vpop.f32.mrb[3].mxu1 }
  0xf1   :  { %v561_v0 = vpop.eup %560  ;;  %564 = vtanh.f32 %v273_v59 }
  0xf2   :  { %v563_v1 = vpop.eup %562  ;;  %v361_v2 = vadd.f32 1.0, %v561_v0  ;;  %v430_v3 = vmul.f32 -1.442695, %v347_v62 }
  0xf3   :  { %v354_v4 = vadd.f32 1.0, %v563_v1 }
  0xf4   :  { %566 = vrcp.f32 %v361_v2 }
  0xf5   :  { %568 = vrcp.f32 %v354_v4 }
  0xf6   :  { %570 = vpow2.f32 %v430_v3 }
  0xfb   :  { %v565_v5 = vpop.eup %564 }
  0xfe   :  { %v567_v7 = vpop.eup %566 }
  0xff   :  { %v569_v8 = vpop.eup %568  ;;  %v365_v9 = vmul.f32 %v567_v7, %v565_v5 }
 0x100   :  { %v571_v10 = vpop.eup %570  ;;  %v357_v11 = vmul.f32 %v569_v8, %v350_v6 }
 0x101   :  { %v370_v12 = vadd.f32 1.0, %v571_v10 }
 0x102   :  { %v366_v13 = vadd.f32 %v365_v9, %v357_v11 }
 0x103   :  { %572 = vrcp.f32 %v370_v12 }
 0x104   :  { %574 = vtanh.f32 %v366_v13  ;;  %376 = vst.msk [vmem:[#allocation4] sm:$0xff] %vm375_vm2, %v366_v13 }
 0x105   :  { %587 = shalt.err (!%p584_p4)
}
 0x106   :  { %s588_s23 = scalar_lea.hbm %s791_s5, 128 }
 0x107   :  { %p589_p5 = scmp.ne.s32.totalorder %s791_s5, %s588_s23  ;;  %p592_p6 = scmp.lt.u32.totalorder %s588_s23, %s791_s5 }
 0x109   :  { %p594_p7 = pnand %p592_p6, %p589_p5 }
 0x10b   :  { %597 = shalt.err (!%p594_p7)
}
 0x10c   :  { %397 = dma.vmem_to_hbm [thread:$0]  %s395_s20, 128, %s791_s5, [#allocation5]  }
 0x10d   :  { %s628_s30 = smov [#allocation2]   ;;  %v573_v14 = vpop.eup %572 }
 0x10e   :  { %s384_s6 = sshll.u32 %s628_s30, 4  ;;  %v575_v15 = vpop.eup %574  ;;  %s385_s6 = int_to_ptr.vmem [resolvable:$true] %s384_s6 }
 0x10f   :  { %v374_v16 = vmul.f32 %v575_v15, %v573_v14  ;;  %s598_s7 = scalar_lea.vmem %s385_s6, 128  ;;  %p603_p9 = scmp.lt.s32.totalorder %s385_s6, %s385_s6 }
 0x110   :  { %p599_p8 = scmp.ne.s32.totalorder %s385_s6, %s598_s7  ;;  %p604_p10 = scmp.lt.s32.totalorder %s598_s7, %s598_s7 }
 0x111   :  { %377 = vst.msk [vmem:[#allocation2] sm:$0xff] %vm375_vm2, %v374_v16 }
 0x112   :  { %p605_p11 = por %p604_p10, %p603_p9 }
 0x114   :  { %p606_p12 = pnand %p605_p11, %p599_p8 }
 0x116   :  { %609 = shalt.err (!%p606_p12)
}
 0x117   :  { %s610_s9 = scalar_lea.hbm %s790_s4, 128 }
 0x118   :  { %p611_p13 = scmp.ne.s32.totalorder %s790_s4, %s610_s9  ;;  %p614_p0 = scmp.lt.u32.totalorder %s610_s9, %s790_s4 }
 0x11a   :  { %p616_p1 = pnand %p614_p0, %p611_p13 }
 0x11c   :  { %619 = shalt.err (!%p616_p1)
}
 0x11d   :  { %387 = dma.vmem_to_hbm [thread:$0]  %s385_s6, 128, %s790_s4, [#allocation3]  }
 0x11e   :  { %620 = dma.done.wait [#allocation3], 128  }
 0x11f   :  { %621 = vsyncadd [#allocation3], 4294967168 }
 0x120   :  { %622 = dma.done.wait [#allocation5], 128  }
 0x121   :  { %623 = vsyncadd [#allocation5], 4294967168 }
 0x122   :  { %404 = vsyncpa [#allocation3], 1 }
 0x123   :  { %405 = vsyncpa [#allocation5], 1 }

</bundles_post_ra>
